<compile_context>
chip_gen: v7x
topology: tpu7x:2x2x1
jax: 0.10.0
libtpu: 0.0.40
codegen_flags: <defaults>
</compile_context>

<pallas_src>
import jax
import jax.numpy as jnp
from jax.experimental import pallas as pl
from jax.experimental.pallas import tpu as pltpu

EPS = 1e-5
_VMEM_LIMIT = 32 * 1024 * 1024


def _round_up(n, m):
    return (n + m - 1) // m * m


def _pick_rows_per_tile(H, W, max_ch, tile_budget_bytes=2 << 20):
    """Rows per spatial tile: T | H and (T*W) % 128 == 0, sized for VMEM."""
    valid = [t for t in range(1, H + 1) if H % t == 0 and (t * W) % 128 == 0]
    if not valid:
        return None  # fall back to one whole-(N*H*W) tile
    # ~8 live (channels x lanes) f32 tiles per step (3 double-buffered haloed
    # inputs + accumulator + output); keep comfortably inside the budget.
    fits = [t for t in valid if 8 * max_ch * t * W * 4 <= tile_budget_bytes]
    return fits[-1] if fits else valid[0]


# ------------------------------ conv kernel -------------------------------- #

def _make_conv_stats_kernel(*, H, W, L, blocks_per_img, pre_bn, compute_dtype):
    """Conv3x3 (+ optional fused pre-BN+ReLU on the input) + Welford stats."""
    T = L // W  # rows per tile

    def kernel(*refs):
        if pre_bn:
            (xu_ref, xc_ref, xd_ref, idx_ref, w_ref, b_ref, sc_ref, sh_ref,
             y_ref, mean_ref, m2_ref) = refs
        else:
            (xu_ref, xc_ref, xd_ref, idx_ref, w_ref, b_ref,
             y_ref, mean_ref, m2_ref) = refs

        i = pl.program_id(0)

        # Precomputed per-lane indices (resident input; no div/mod per step).
        colw = idx_ref[0:1, :]       # (1, L)  lane column within a row
        row_img = idx_ref[1:2, :]    # (1, L)  base row within its image
        row_tile = idx_ref[2:3, :]   # (1, L)  local row within this tile
        h = row_img + (i % blocks_per_img) * T   # (1, L) row within the image

        def act(ref):
            a = ref[...].astype(jnp.float32)
            if pre_bn:   # fused BN1 + ReLU of the previous layer (f32 math)
                a = jnp.maximum(a * sc_ref[...] + sh_ref[...], 0.0)
            return a

        xc = act(xc_ref)
        # Merge the single halo row from the neighbour block so dy taps only
        # need short in-tile lane rolls (wrap positions land on halo data).
        srcs = {
            -1: jnp.where(row_tile == T - 1, act(xu_ref), xc),
            0: xc,
            1: jnp.where(row_tile == 0, act(xd_ref), xc),
        }

        acc = jnp.zeros(y_ref.shape, jnp.float32)
        tap = 0
        for dy in (-1, 0, 1):
            src = srcs[dy]
            hv = None if dy == 0 else ((h + dy >= 0) & (h + dy < H))
            for dx in (-1, 0, 1):
                shift = (-(dy * W + dx)) % L
                tx = src if shift == 0 else pltpu.roll(src, shift, axis=1)
                wv = None if dx == 0 else ((colw + dx >= 0) & (colw + dx < W))
                if hv is None and wv is None:
                    col = tx
                else:
                    m = hv if wv is None else (wv if hv is None else hv & wv)
                    col = jnp.where(m, tx, 0.0)
                # Tap-accumulated matmul (no im2col); MXU fed compute_dtype,
                # accumulation in f32.
                acc = acc + jnp.dot(w_ref[tap], col.astype(compute_dtype),
                                    preferred_element_type=jnp.float32)
                tap += 1

        y = acc + b_ref[...]                       # conv bias
        y_ref[...] = y.astype(y_ref.dtype)

        # Two-pass BN, pass 1: per-tile centered stats merged into resident
        # accumulators with Chan/Welford (avoids E[y^2]-E[y]^2 cancellation).
        mu_t = jnp.mean(y, axis=1, keepdims=True)              # (F, 1)
        d = y - mu_t
        m2_t = jnp.sum(d * d, axis=1, keepdims=True)           # (F, 1)

        @pl.when(i == 0)
        def _():
            mean_ref[...] = mu_t
            m2_ref[...] = m2_t

        @pl.when(i > 0)
        def _():
            den = (jnp.full((1, 1), 1, jnp.int32) + i).astype(jnp.float32)
            r = 1.0 / den                                      # 1 / (i + 1)
            delta = mu_t - mean_ref[...]
            mean_ref[...] = mean_ref[...] + delta * r
            m2_ref[...] = (m2_ref[...] + m2_t
                           + delta * delta * (float(L) * (1.0 - r)))

    return kernel


def _conv_bn_stats(x_cm, lane_idx, w_taps, bias, scale, shift, *,
                   H, W, L, nblocks, blocks_per_img, compute_dtype):
    Cin_p, NHW = x_cm.shape
    Fout_p = w_taps.shape[1]
    pre_bn = scale is not None
    nb = nblocks

    kernel = _make_conv_stats_kernel(
        H=H, W=W, L=L, blocks_per_img=blocks_per_img,
        pre_bn=pre_bn, compute_dtype=compute_dtype)

    def const(shape):
        n = len(shape)
        return pl.BlockSpec(shape, lambda i, _n=n: (0,) * _n)

    # Centre block plus clamped up/down neighbour blocks (1-block halo).
    # TODO(synk): when W >= 128, shrink the halo reads to 1-row blocks instead
    # of full neighbour blocks to cut the 3x activation DMA.
    in_specs = [
        pl.BlockSpec((Cin_p, L), lambda i: (0, jnp.maximum(i - 1, 0))),
        pl.BlockSpec((Cin_p, L), lambda i: (0, i)),
        pl.BlockSpec((Cin_p, L), lambda i: (0, jnp.minimum(i + 1, nb - 1))),
        const(lane_idx.shape),
        const(w_taps.shape),
        const(bias.shape),
    ]
    args = [x_cm, x_cm, x_cm, lane_idx, w_taps, bias]
    if pre_bn:
        in_specs += [const(scale.shape), const(shift.shape)]
        args += [scale, shift]

    out_shape = (jax.ShapeDtypeStruct((Fout_p, NHW), jnp.float32),
                 jax.ShapeDtypeStruct((Fout_p, 1), jnp.float32),
                 jax.ShapeDtypeStruct((Fout_p, 1), jnp.float32))
    out_specs = (pl.BlockSpec((Fout_p, L), lambda i: (0, i)),
                 pl.BlockSpec((Fout_p, 1), lambda i: (0, 0)),   # resident mean
                 pl.BlockSpec((Fout_p, 1), lambda i: (0, 0)))   # resident M2

    # TODO(synk): for v7x megacore, split the grid into a leading "parallel"
    # axis with per-core partial (mean, M2) outputs merged in the wrapper.
    return pl.pallas_call(
        kernel, out_shape=out_shape, grid=(nblocks,),
        in_specs=in_specs, out_specs=out_specs,
        compiler_params=pltpu.CompilerParams(
            dimension_semantics=("arbitrary",),
            vmem_limit_bytes=_VMEM_LIMIT),
    )(*args)


# --------------------------- BN apply kernel -------------------------------- #

def _bn_apply_kernel(y_ref, sc_ref, sh_ref, o_ref):
    y = y_ref[...].astype(jnp.float32)
    o_ref[...] = jnp.maximum(y * sc_ref[...] + sh_ref[...], 0.0
                             ).astype(o_ref.dtype)


def _bn_scale_shift(mean, m2, gamma, beta, count):
    var = m2 / float(count)                       # biased, training-mode BN
    scale = gamma * jax.lax.rsqrt(var + EPS)
    return scale, beta - mean * scale


# ------------------------------- wrapper ------------------------------------ #

def block_forward(x_nchw, params, *, compute_dtype=jnp.bfloat16,
                  rows_per_tile=None):
    N, Cin, H, W = x_nchw.shape
    F = params["w1"].shape[-1]
    NHW = N * H * W
    Cp, Fp = _round_up(Cin, 8), _round_up(F, 8)

    if rows_per_tile is None:
        rows_per_tile = _pick_rows_per_tile(H, W, max(Cp, Fp))
    if rows_per_tile is None:
        L = NHW                                    # single whole-array tile
    else:
        if H % rows_per_tile or (rows_per_tile * W) % 128:
            raise ValueError("rows_per_tile must divide H with T*W % 128 == 0")
        L = rows_per_tile * W
    nblocks = NHW // L
    blocks_per_img = max((H * W) // L, 1)

    # TODO(synk): the NCHW <-> (C, N*H*W) relayouts are extra HBM passes; at
    # real sizes accept/produce the kernel-native layout (or NHWC) instead.
    x_cm = jnp.transpose(x_nchw, (1, 0, 2, 3)).reshape(Cin, NHW)
    x_cm = jnp.pad(x_cm.astype(jnp.float32), ((0, Cp - Cin), (0, 0)))

    # Per-lane index vectors (computed once, resident in the kernels).
    lane = jnp.arange(L, dtype=jnp.int32)
    lane_idx = jnp.stack([lane % W, (lane // W) % H, lane // W], axis=0)

    def prep_w(w, cin_p, fout_p):      # HWIO (3,3,cin,f) -> (9, fout_p, cin_p)
        kh, kw, cin, f = w.shape
        w = jnp.pad(w, ((0, 0), (0, 0), (0, cin_p - cin), (0, fout_p - f)))
        w = jnp.transpose(w, (0, 1, 3, 2)).reshape(kh * kw, fout_p, cin_p)
        return w.astype(compute_dtype)

    def prep_v(v, fp):                 # (1, f) -> (fp, 1) f32
        f = v.size
        return jnp.pad(v.reshape(f, 1).astype(jnp.float32),
                       ((0, fp - f), (0, 0)))

    w1, b1 = prep_w(params["w1"], Cp, Fp), prep_v(params["b1"], Fp)
    w2, b2 = prep_w(params["w2"], Fp, Fp), prep_v(params["b2"], Fp)
    g1, be1 = prep_v(params["g1"], Fp), prep_v(params["beta1"], Fp)
    g2, be2 = prep_v(params["g2"], Fp), prep_v(params["beta2"], Fp)

    common = dict(H=H, W=W, L=L, nblocks=nblocks,
                  blocks_per_img=blocks_per_img, compute_dtype=compute_dtype)

    # conv1 (+ stats)  ->  BN1 finalize  ->  BN1+ReLU+conv2 (+ stats)
    y1, mean1, m21 = _conv_bn_stats(x_cm, lane_idx, w1, b1, None, None,
                                    **common)
    sc1, sh1 = _bn_scale_shift(mean1, m21, g1, be1, NHW)
    y2, mean2, m22 = _conv_bn_stats(y1, lane_idx, w2, b2, sc1, sh1, **common)
    sc2, sh2 = _bn_scale_shift(mean2, m22, g2, be2, NHW)

    # BN2 + ReLU apply pass ("parallel": no cross-step state).
    out_cm = pl.pallas_call(
        _bn_apply_kernel,
        out_shape=jax.ShapeDtypeStruct((Fp, NHW), x_nchw.dtype),
        grid=(nblocks,),
        in_specs=[pl.BlockSpec((Fp, L), lambda i: (0, i)),
                  pl.BlockSpec((Fp, 1), lambda i: (0, 0)),
                  pl.BlockSpec((Fp, 1), lambda i: (0, 0))],
        out_specs=pl.BlockSpec((Fp, L), lambda i: (0, i)),
        compiler_params=pltpu.CompilerParams(
            dimension_semantics=("parallel",),
            vmem_limit_bytes=_VMEM_LIMIT),
    )(y2, sc2, sh2)

    return jnp.transpose(out_cm[:F].reshape(F, N, H, W), (1, 0, 2, 3))


# --------------------------- pure-JAX reference ----------------------------- #

def block_reference(x_nchw, params):
    x = jnp.transpose(x_nchw, (0, 2, 3, 1))

    def conv(h, w, b):
        y = jax.lax.conv_general_dilated(
            h, w, window_strides=(1, 1), padding="SAME",
            dimension_numbers=("NHWC", "HWIO", "NHWC"))
        return y + b.reshape(1, 1, 1, -1)

    def bn_relu(h, g, bt):
        m = jnp.mean(h, axis=(0, 1, 2), keepdims=True)
        v = jnp.mean((h - m) ** 2, axis=(0, 1, 2), keepdims=True)
        return jnp.maximum(
            (h - m) / jnp.sqrt(v + EPS) * g.reshape(1, 1, 1, -1)
            + bt.reshape(1, 1, 1, -1), 0.0)

    h = bn_relu(conv(x, params["w1"], params["b1"]),
                params["g1"], params["beta1"])
    h = bn_relu(conv(h, params["w2"], params["b2"]),
                params["g2"], params["beta2"])
    return jnp.transpose(h, (0, 3, 1, 2))


# ---------------------------------- main ------------------------------------ #

if __name__ == "__main__":
    key = jax.random.PRNGKey(0)
    N, Cin, H, W, F = 2, 4, 16, 16, 8
    ks = jax.random.split(key, 9)

    x = jax.random.normal(ks[0], (N, Cin, H, W), jnp.float32)
    params = dict(
        w1=0.1 * jax.random.normal(ks[1], (3, 3, Cin, F), jnp.float32),
        b1=0.05 * jax.random.normal(ks[2], (1, F), jnp.float32),
        g1=1.0 + 0.1 * jax.random.normal(ks[3], (1, F), jnp.float32),
        beta1=0.05 * jax.random.normal(ks[4], (1, F), jnp.float32),
        w2=0.1 * jax.random.normal(ks[5], (3, 3, F, F), jnp.float32),
        b2=0.05 * jax.random.normal(ks[6], (1, F), jnp.float32),
        g2=1.0 + 0.1 * jax.random.normal(ks[7], (1, F), jnp.float32),
        beta2=0.05 * jax.random.normal(ks[8], (1, F), jnp.float32),
    )

    ref = block_reference(x, params)
    configs = [
        (jnp.float32, None, 1e-4),   # heuristic tiling, exact-precision check
        (jnp.float32, 8, 1e-4),      # 8-row tiles: exercises interior halo
        (jnp.bfloat16, 8, 3e-2),     # bf16 MXU operands, f32 accum / BN math
    ]
    for dt, rows, tol in configs:
        out = jax.block_until_ready(
            block_forward(x, params, compute_dtype=dt, rows_per_tile=rows))
        assert out.shape == (N, F, H, W)
        err = float(jnp.max(jnp.abs(out - ref)))
        assert bool(jnp.allclose(out, ref, atol=tol, rtol=tol)), (dt, rows, err)
    print("KERNEL_OK")
</pallas_src>

<mosaic_0001>
module attributes {stable_mosaic.version = 11 : i64} {
  func.func @kernel(%arg0: i32, %arg1: memref<8x256xf32, #tpu.memory_space<vmem>>, %arg2: memref<8x256xf32, #tpu.memory_space<vmem>>, %arg3: memref<8x256xf32, #tpu.memory_space<vmem>>, %arg4: memref<3x256xi32, #tpu.memory_space<vmem>>, %arg5: memref<9x8x8xf32, #tpu.memory_space<vmem>>, %arg6: memref<8x1xf32, #tpu.memory_space<vmem>>, %arg7: memref<8x256xf32, #tpu.memory_space<vmem>>, %arg8: memref<8x1xf32, #tpu.memory_space<vmem>>, %arg9: memref<8x1xf32, #tpu.memory_space<vmem>>) attributes {dimension_semantics = [#tpu.dimension_semantics<arbitrary>], iteration_bounds = array<i64: 2>, scalar_prefetch = 0 : i64, scratch_operands = 0 : i64, tpu.core_type = #tpu.core_type<tc>, window_params = [{transform_indices = @transform_0, window_bounds = array<i64: 8, 256>}, {transform_indices = @transform_1, window_bounds = array<i64: 8, 256>}, {transform_indices = @transform_2, window_bounds = array<i64: 8, 256>}, {pipeline_mode = #tpu.pipeline_mode<synchronous>, transform_indices = @transform_3, window_bounds = array<i64: 3, 256>}, {pipeline_mode = #tpu.pipeline_mode<synchronous>, transform_indices = @transform_4, window_bounds = array<i64: 9, 8, 8>}, {pipeline_mode = #tpu.pipeline_mode<synchronous>, transform_indices = @transform_5, window_bounds = array<i64: 8, 1>}, {transform_indices = @transform_6, window_bounds = array<i64: 8, 256>}, {pipeline_mode = #tpu.pipeline_mode<synchronous>, transform_indices = @transform_7, window_bounds = array<i64: 8, 1>}, {pipeline_mode = #tpu.pipeline_mode<synchronous>, transform_indices = @transform_8, window_bounds = array<i64: 8, 1>}]} {
    %c0 = arith.constant 0 : index
    %c0_0 = arith.constant 0 : index
    %0 = vector.load %arg4[%c0, %c0_0] : memref<3x256xi32, #tpu.memory_space<vmem>>, vector<1x256xi32>
    %c1 = arith.constant 1 : index
    %c0_1 = arith.constant 0 : index
    %1 = vector.load %arg4[%c1, %c0_1] : memref<3x256xi32, #tpu.memory_space<vmem>>, vector<1x256xi32>
    %c2 = arith.constant 2 : index
    %c0_2 = arith.constant 0 : index
    %2 = vector.load %arg4[%c2, %c0_2] : memref<3x256xi32, #tpu.memory_space<vmem>>, vector<1x256xi32>
    %c1_i32 = arith.constant 1 : i32
    %c0_i32 = arith.constant 0 : i32
    %3 = arith.cmpi eq, %c1_i32, %c0_i32 : i32
    %c1_i32_3 = arith.constant 1 : i32
    %4 = arith.select %3, %c1_i32_3, %c1_i32 : i32
    %5 = arith.remsi %arg0, %4 : i32
    %c0_i32_4 = arith.constant 0 : i32
    %6 = arith.cmpi ne, %5, %c0_i32_4 : i32
    %c0_i32_5 = arith.constant 0 : i32
    %7 = arith.cmpi slt, %5, %c0_i32_5 : i32
    %c0_i32_6 = arith.constant 0 : i32
    %8 = arith.cmpi slt, %4, %c0_i32_6 : i32
    %9 = arith.xori %7, %8 : i1
    %10 = arith.andi %9, %6 : i1
    %11 = arith.addi %5, %4 : i32
    %12 = arith.select %10, %11, %5 : i32
    %c16_i32 = arith.constant 16 : i32
    %13 = arith.muli %12, %c16_i32 : i32
    %14 = vector.broadcast %13 : i32 to vector<1x256xi32>
    %15 = arith.addi %1, %14 : vector<1x256xi32>
    %c0_7 = arith.constant 0 : index
    %c0_8 = arith.constant 0 : index
    %16 = vector.load %arg2[%c0_7, %c0_8] : memref<8x256xf32, #tpu.memory_space<vmem>>, vector<8x256xf32>
    %c15_i32 = arith.constant 15 : i32
    %17 = vector.broadcast %c15_i32 : i32 to vector<1x256xi32>
    %18 = arith.cmpi eq, %2, %17 : vector<1x256xi32>
    %c0_9 = arith.constant 0 : index
    %c0_10 = arith.constant 0 : index
    %19 = vector.load %arg1[%c0_9, %c0_10] : memref<8x256xf32, #tpu.memory_space<vmem>>, vector<8x256xf32>
    %20 = vector.shape_cast %18 : vector<1x256xi1> to vector<1x256xi1>
    %21 = vector.broadcast %20 : vector<1x256xi1> to vector<8x256xi1>
    %22 = arith.select %21, %19, %16 : vector<8x256xi1>, vector<8x256xf32>
    %c0_i32_11 = arith.constant 0 : i32
    %23 = vector.broadcast %c0_i32_11 : i32 to vector<1x256xi32>
    %24 = arith.cmpi eq, %2, %23 : vector<1x256xi32>
    %c0_12 = arith.constant 0 : index
    %c0_13 = arith.constant 0 : index
    %25 = vector.load %arg3[%c0_12, %c0_13] : memref<8x256xf32, #tpu.memory_space<vmem>>, vector<8x256xf32>
    %26 = vector.shape_cast %24 : vector<1x256xi1> to vector<1x256xi1>
    %27 = vector.broadcast %26 : vector<1x256xi1> to vector<8x256xi1>
    %28 = arith.select %27, %25, %16 : vector<8x256xi1>, vector<8x256xf32>
    %cst = arith.constant 0.000000e+00 : f32
    %29 = vector.broadcast %cst : f32 to vector<8x256xf32>
    %c-1_i32 = arith.constant -1 : i32
    %30 = vector.broadcast %c-1_i32 : i32 to vector<1x256xi32>
    %31 = arith.addi %15, %30 : vector<1x256xi32>
    %c0_i32_14 = arith.constant 0 : i32
    %32 = vector.broadcast %c0_i32_14 : i32 to vector<1x256xi32>
    %33 = arith.cmpi sge, %31, %32 : vector<1x256xi32>
    %c-1_i32_15 = arith.constant -1 : i32
    %34 = vector.broadcast %c-1_i32_15 : i32 to vector<1x256xi32>
    %35 = arith.addi %15, %34 : vector<1x256xi32>
    %c16_i32_16 = arith.constant 16 : i32
    %36 = vector.broadcast %c16_i32_16 : i32 to vector<1x256xi32>
    %37 = arith.cmpi slt, %35, %36 : vector<1x256xi32>
    %38 = arith.andi %33, %37 : vector<1x256xi1>
    %c17_i32 = arith.constant 17 : i32
    %39 = tpu.dynamic_rotate %22 by %c17_i32 dim 1 : vector<8x256xf32>, i32 -> vector<8x256xf32>
    %c-1_i32_17 = arith.constant -1 : i32
    %40 = vector.broadcast %c-1_i32_17 : i32 to vector<1x256xi32>
    %41 = arith.addi %0, %40 : vector<1x256xi32>
    %c0_i32_18 = arith.constant 0 : i32
    %42 = vector.broadcast %c0_i32_18 : i32 to vector<1x256xi32>
    %43 = arith.cmpi sge, %41, %42 : vector<1x256xi32>
    %c-1_i32_19 = arith.constant -1 : i32
    %44 = vector.broadcast %c-1_i32_19 : i32 to vector<1x256xi32>
    %45 = arith.addi %0, %44 : vector<1x256xi32>
    %c16_i32_20 = arith.constant 16 : i32
    %46 = vector.broadcast %c16_i32_20 : i32 to vector<1x256xi32>
    %47 = arith.cmpi slt, %45, %46 : vector<1x256xi32>
    %48 = arith.andi %43, %47 : vector<1x256xi1>
    %49 = arith.andi %38, %48 : vector<1x256xi1>
    %cst_21 = arith.constant 0.000000e+00 : f32
    %50 = vector.shape_cast %49 : vector<1x256xi1> to vector<1x256xi1>
    %51 = vector.broadcast %50 : vector<1x256xi1> to vector<8x256xi1>
    %52 = vector.broadcast %cst_21 : f32 to vector<8x256xf32>
    %53 = arith.select %51, %39, %52 : vector<8x256xi1>, vector<8x256xf32>
    %c0_22 = arith.constant 0 : index
    %c0_23 = arith.constant 0 : index
    %c0_24 = arith.constant 0 : index
    %54 = vector.load %arg5[%c0_22, %c0_23, %c0_24] : memref<9x8x8xf32, #tpu.memory_space<vmem>>, vector<1x8x8xf32>
    %55 = vector.shape_cast %54 : vector<1x8x8xf32> to vector<8x8xf32>
    %cst_25 = arith.constant dense<0.000000e+00> : vector<8x256xf32>
    %56 = tpu.matmul %55, %53, %cst_25 {dimension_numbers = #tpu.dot_dimension_numbers<[1], [0], [0], [1], [0, 0, 1, 1], [], []>} : vector<8x8xf32>, vector<8x256xf32>, vector<8x256xf32> -> vector<8x256xf32>
    %57 = arith.addf %29, %56 : vector<8x256xf32>
    %c16_i32_26 = arith.constant 16 : i32
    %58 = tpu.dynamic_rotate %22 by %c16_i32_26 dim 1 : vector<8x256xf32>, i32 -> vector<8x256xf32>
    %cst_27 = arith.constant 0.000000e+00 : f32
    %59 = vector.shape_cast %38 : vector<1x256xi1> to vector<1x256xi1>
    %60 = vector.broadcast %59 : vector<1x256xi1> to vector<8x256xi1>
    %61 = vector.broadcast %cst_27 : f32 to vector<8x256xf32>
    %62 = arith.select %60, %58, %61 : vector<8x256xi1>, vector<8x256xf32>
    %c1_28 = arith.constant 1 : index
    %c0_29 = arith.constant 0 : index
    %c0_30 = arith.constant 0 : index
    %63 = vector.load %arg5[%c1_28, %c0_29, %c0_30] : memref<9x8x8xf32, #tpu.memory_space<vmem>>, vector<1x8x8xf32>
    %64 = vector.shape_cast %63 : vector<1x8x8xf32> to vector<8x8xf32>
    %cst_31 = arith.constant dense<0.000000e+00> : vector<8x256xf32>
    %65 = tpu.matmul %64, %62, %cst_31 {dimension_numbers = #tpu.dot_dimension_numbers<[1], [0], [0], [1], [0, 0, 1, 1], [], []>} : vector<8x8xf32>, vector<8x256xf32>, vector<8x256xf32> -> vector<8x256xf32>
    %66 = arith.addf %57, %65 : vector<8x256xf32>
    %c15_i32_32 = arith.constant 15 : i32
    %67 = tpu.dynamic_rotate %22 by %c15_i32_32 dim 1 : vector<8x256xf32>, i32 -> vector<8x256xf32>
    %c1_i32_33 = arith.constant 1 : i32
    %68 = vector.broadcast %c1_i32_33 : i32 to vector<1x256xi32>
    %69 = arith.addi %0, %68 : vector<1x256xi32>
    %c0_i32_34 = arith.constant 0 : i32
    %70 = vector.broadcast %c0_i32_34 : i32 to vector<1x256xi32>
    %71 = arith.cmpi sge, %69, %70 : vector<1x256xi32>
    %c1_i32_35 = arith.constant 1 : i32
    %72 = vector.broadcast %c1_i32_35 : i32 to vector<1x256xi32>
    %73 = arith.addi %0, %72 : vector<1x256xi32>
    %c16_i32_36 = arith.constant 16 : i32
    %74 = vector.broadcast %c16_i32_36 : i32 to vector<1x256xi32>
    %75 = arith.cmpi slt, %73, %74 : vector<1x256xi32>
    %76 = arith.andi %71, %75 : vector<1x256xi1>
    %77 = arith.andi %38, %76 : vector<1x256xi1>
    %cst_37 = arith.constant 0.000000e+00 : f32
    %78 = vector.shape_cast %77 : vector<1x256xi1> to vector<1x256xi1>
    %79 = vector.broadcast %78 : vector<1x256xi1> to vector<8x256xi1>
    %80 = vector.broadcast %cst_37 : f32 to vector<8x256xf32>
    %81 = arith.select %79, %67, %80 : vector<8x256xi1>, vector<8x256xf32>
    %c2_38 = arith.constant 2 : index
    %c0_39 = arith.constant 0 : index
    %c0_40 = arith.constant 0 : index
    %82 = vector.load %arg5[%c2_38, %c0_39, %c0_40] : memref<9x8x8xf32, #tpu.memory_space<vmem>>, vector<1x8x8xf32>
    %83 = vector.shape_cast %82 : vector<1x8x8xf32> to vector<8x8xf32>
    %cst_41 = arith.constant dense<0.000000e+00> : vector<8x256xf32>
    %84 = tpu.matmul %83, %81, %cst_41 {dimension_numbers = #tpu.dot_dimension_numbers<[1], [0], [0], [1], [0, 0, 1, 1], [], []>} : vector<8x8xf32>, vector<8x256xf32>, vector<8x256xf32> -> vector<8x256xf32>
    %85 = arith.addf %66, %84 : vector<8x256xf32>
    %c1_i32_42 = arith.constant 1 : i32
    %86 = tpu.dynamic_rotate %16 by %c1_i32_42 dim 1 : vector<8x256xf32>, i32 -> vector<8x256xf32>
    %c-1_i32_43 = arith.constant -1 : i32
    %87 = vector.broadcast %c-1_i32_43 : i32 to vector<1x256xi32>
    %88 = arith.addi %0, %87 : vector<1x256xi32>
    %c0_i32_44 = arith.constant 0 : i32
    %89 = vector.broadcast %c0_i32_44 : i32 to vector<1x256xi32>
    %90 = arith.cmpi sge, %88, %89 : vector<1x256xi32>
    %c-1_i32_45 = arith.constant -1 : i32
    %91 = vector.broadcast %c-1_i32_45 : i32 to vector<1x256xi32>
    %92 = arith.addi %0, %91 : vector<1x256xi32>
    %c16_i32_46 = arith.constant 16 : i32
    %93 = vector.broadcast %c16_i32_46 : i32 to vector<1x256xi32>
    %94 = arith.cmpi slt, %92, %93 : vector<1x256xi32>
    %95 = arith.andi %90, %94 : vector<1x256xi1>
    %cst_47 = arith.constant 0.000000e+00 : f32
    %96 = vector.shape_cast %95 : vector<1x256xi1> to vector<1x256xi1>
    %97 = vector.broadcast %96 : vector<1x256xi1> to vector<8x256xi1>
    %98 = vector.broadcast %cst_47 : f32 to vector<8x256xf32>
    %99 = arith.select %97, %86, %98 : vector<8x256xi1>, vector<8x256xf32>
    %c3 = arith.constant 3 : index
    %c0_48 = arith.constant 0 : index
    %c0_49 = arith.constant 0 : index
    %100 = vector.load %arg5[%c3, %c0_48, %c0_49] : memref<9x8x8xf32, #tpu.memory_space<vmem>>, vector<1x8x8xf32>
    %101 = vector.shape_cast %100 : vector<1x8x8xf32> to vector<8x8xf32>
    %cst_50 = arith.constant dense<0.000000e+00> : vector<8x256xf32>
    %102 = tpu.matmul %101, %99, %cst_50 {dimension_numbers = #tpu.dot_dimension_numbers<[1], [0], [0], [1], [0, 0, 1, 1], [], []>} : vector<8x8xf32>, vector<8x256xf32>, vector<8x256xf32> -> vector<8x256xf32>
    %103 = arith.addf %85, %102 : vector<8x256xf32>
    %c4 = arith.constant 4 : index
    %c0_51 = arith.constant 0 : index
    %c0_52 = arith.constant 0 : index
    %104 = vector.load %arg5[%c4, %c0_51, %c0_52] : memref<9x8x8xf32, #tpu.memory_space<vmem>>, vector<1x8x8xf32>
    %105 = vector.shape_cast %104 : vector<1x8x8xf32> to vector<8x8xf32>
    %cst_53 = arith.constant dense<0.000000e+00> : vector<8x256xf32>
    %106 = tpu.matmul %105, %16, %cst_53 {dimension_numbers = #tpu.dot_dimension_numbers<[1], [0], [0], [1], [0, 0, 1, 1], [], []>} : vector<8x8xf32>, vector<8x256xf32>, vector<8x256xf32> -> vector<8x256xf32>
    %107 = arith.addf %103, %106 : vector<8x256xf32>
    %c255_i32 = arith.constant 255 : i32
    %108 = tpu.dynamic_rotate %16 by %c255_i32 dim 1 : vector<8x256xf32>, i32 -> vector<8x256xf32>
    %c1_i32_54 = arith.constant 1 : i32
    %109 = vector.broadcast %c1_i32_54 : i32 to vector<1x256xi32>
    %110 = arith.addi %0, %109 : vector<1x256xi32>
    %c0_i32_55 = arith.constant 0 : i32
    %111 = vector.broadcast %c0_i32_55 : i32 to vector<1x256xi32>
    %112 = arith.cmpi sge, %110, %111 : vector<1x256xi32>
    %c1_i32_56 = arith.constant 1 : i32
    %113 = vector.broadcast %c1_i32_56 : i32 to vector<1x256xi32>
    %114 = arith.addi %0, %113 : vector<1x256xi32>
    %c16_i32_57 = arith.constant 16 : i32
    %115 = vector.broadcast %c16_i32_57 : i32 to vector<1x256xi32>
    %116 = arith.cmpi slt, %114, %115 : vector<1x256xi32>
    %117 = arith.andi %112, %116 : vector<1x256xi1>
    %cst_58 = arith.constant 0.000000e+00 : f32
    %118 = vector.shape_cast %117 : vector<1x256xi1> to vector<1x256xi1>
    %119 = vector.broadcast %118 : vector<1x256xi1> to vector<8x256xi1>
    %120 = vector.broadcast %cst_58 : f32 to vector<8x256xf32>
    %121 = arith.select %119, %108, %120 : vector<8x256xi1>, vector<8x256xf32>
    %c5 = arith.constant 5 : index
    %c0_59 = arith.constant 0 : index
    %c0_60 = arith.constant 0 : index
    %122 = vector.load %arg5[%c5, %c0_59, %c0_60] : memref<9x8x8xf32, #tpu.memory_space<vmem>>, vector<1x8x8xf32>
    %123 = vector.shape_cast %122 : vector<1x8x8xf32> to vector<8x8xf32>
    %cst_61 = arith.constant dense<0.000000e+00> : vector<8x256xf32>
    %124 = tpu.matmul %123, %121, %cst_61 {dimension_numbers = #tpu.dot_dimension_numbers<[1], [0], [0], [1], [0, 0, 1, 1], [], []>} : vector<8x8xf32>, vector<8x256xf32>, vector<8x256xf32> -> vector<8x256xf32>
    %125 = arith.addf %107, %124 : vector<8x256xf32>
    %c1_i32_62 = arith.constant 1 : i32
    %126 = vector.broadcast %c1_i32_62 : i32 to vector<1x256xi32>
    %127 = arith.addi %15, %126 : vector<1x256xi32>
    %c0_i32_63 = arith.constant 0 : i32
    %128 = vector.broadcast %c0_i32_63 : i32 to vector<1x256xi32>
    %129 = arith.cmpi sge, %127, %128 : vector<1x256xi32>
    %c1_i32_64 = arith.constant 1 : i32
    %130 = vector.broadcast %c1_i32_64 : i32 to vector<1x256xi32>
    %131 = arith.addi %15, %130 : vector<1x256xi32>
    %c16_i32_65 = arith.constant 16 : i32
    %132 = vector.broadcast %c16_i32_65 : i32 to vector<1x256xi32>
    %133 = arith.cmpi slt, %131, %132 : vector<1x256xi32>
    %134 = arith.andi %129, %133 : vector<1x256xi1>
    %c241_i32 = arith.constant 241 : i32
    %135 = tpu.dynamic_rotate %28 by %c241_i32 dim 1 : vector<8x256xf32>, i32 -> vector<8x256xf32>
    %c-1_i32_66 = arith.constant -1 : i32
    %136 = vector.broadcast %c-1_i32_66 : i32 to vector<1x256xi32>
    %137 = arith.addi %0, %136 : vector<1x256xi32>
    %c0_i32_67 = arith.constant 0 : i32
    %138 = vector.broadcast %c0_i32_67 : i32 to vector<1x256xi32>
    %139 = arith.cmpi sge, %137, %138 : vector<1x256xi32>
    %c-1_i32_68 = arith.constant -1 : i32
    %140 = vector.broadcast %c-1_i32_68 : i32 to vector<1x256xi32>
    %141 = arith.addi %0, %140 : vector<1x256xi32>
    %c16_i32_69 = arith.constant 16 : i32
    %142 = vector.broadcast %c16_i32_69 : i32 to vector<1x256xi32>
    %143 = arith.cmpi slt, %141, %142 : vector<1x256xi32>
    %144 = arith.andi %139, %143 : vector<1x256xi1>
    %145 = arith.andi %134, %144 : vector<1x256xi1>
    %cst_70 = arith.constant 0.000000e+00 : f32
    %146 = vector.shape_cast %145 : vector<1x256xi1> to vector<1x256xi1>
    %147 = vector.broadcast %146 : vector<1x256xi1> to vector<8x256xi1>
    %148 = vector.broadcast %cst_70 : f32 to vector<8x256xf32>
    %149 = arith.select %147, %135, %148 : vector<8x256xi1>, vector<8x256xf32>
    %c6 = arith.constant 6 : index
    %c0_71 = arith.constant 0 : index
    %c0_72 = arith.constant 0 : index
    %150 = vector.load %arg5[%c6, %c0_71, %c0_72] : memref<9x8x8xf32, #tpu.memory_space<vmem>>, vector<1x8x8xf32>
    %151 = vector.shape_cast %150 : vector<1x8x8xf32> to vector<8x8xf32>
    %cst_73 = arith.constant dense<0.000000e+00> : vector<8x256xf32>
    %152 = tpu.matmul %151, %149, %cst_73 {dimension_numbers = #tpu.dot_dimension_numbers<[1], [0], [0], [1], [0, 0, 1, 1], [], []>} : vector<8x8xf32>, vector<8x256xf32>, vector<8x256xf32> -> vector<8x256xf32>
    %153 = arith.addf %125, %152 : vector<8x256xf32>
    %c240_i32 = arith.constant 240 : i32
    %154 = tpu.dynamic_rotate %28 by %c240_i32 dim 1 : vector<8x256xf32>, i32 -> vector<8x256xf32>
    %cst_74 = arith.constant 0.000000e+00 : f32
    %155 = vector.shape_cast %134 : vector<1x256xi1> to vector<1x256xi1>
    %156 = vector.broadcast %155 : vector<1x256xi1> to vector<8x256xi1>
    %157 = vector.broadcast %cst_74 : f32 to vector<8x256xf32>
    %158 = arith.select %156, %154, %157 : vector<8x256xi1>, vector<8x256xf32>
    %c7 = arith.constant 7 : index
    %c0_75 = arith.constant 0 : index
    %c0_76 = arith.constant 0 : index
    %159 = vector.load %arg5[%c7, %c0_75, %c0_76] : memref<9x8x8xf32, #tpu.memory_space<vmem>>, vector<1x8x8xf32>
    %160 = vector.shape_cast %159 : vector<1x8x8xf32> to vector<8x8xf32>
    %cst_77 = arith.constant dense<0.000000e+00> : vector<8x256xf32>
    %161 = tpu.matmul %160, %158, %cst_77 {dimension_numbers = #tpu.dot_dimension_numbers<[1], [0], [0], [1], [0, 0, 1, 1], [], []>} : vector<8x8xf32>, vector<8x256xf32>, vector<8x256xf32> -> vector<8x256xf32>
    %162 = arith.addf %153, %161 : vector<8x256xf32>
    %c239_i32 = arith.constant 239 : i32
    %163 = tpu.dynamic_rotate %28 by %c239_i32 dim 1 : vector<8x256xf32>, i32 -> vector<8x256xf32>
    %c1_i32_78 = arith.constant 1 : i32
    %164 = vector.broadcast %c1_i32_78 : i32 to vector<1x256xi32>
    %165 = arith.addi %0, %164 : vector<1x256xi32>
    %c0_i32_79 = arith.constant 0 : i32
    %166 = vector.broadcast %c0_i32_79 : i32 to vector<1x256xi32>
    %167 = arith.cmpi sge, %165, %166 : vector<1x256xi32>
    %c1_i32_80 = arith.constant 1 : i32
    %168 = vector.broadcast %c1_i32_80 : i32 to vector<1x256xi32>
    %169 = arith.addi %0, %168 : vector<1x256xi32>
    %c16_i32_81 = arith.constant 16 : i32
    %170 = vector.broadcast %c16_i32_81 : i32 to vector<1x256xi32>
    %171 = arith.cmpi slt, %169, %170 : vector<1x256xi32>
    %172 = arith.andi %167, %171 : vector<1x256xi1>
    %173 = arith.andi %134, %172 : vector<1x256xi1>
    %cst_82 = arith.constant 0.000000e+00 : f32
    %174 = vector.shape_cast %173 : vector<1x256xi1> to vector<1x256xi1>
    %175 = vector.broadcast %174 : vector<1x256xi1> to vector<8x256xi1>
    %176 = vector.broadcast %cst_82 : f32 to vector<8x256xf32>
    %177 = arith.select %175, %163, %176 : vector<8x256xi1>, vector<8x256xf32>
    %c8 = arith.constant 8 : index
    %c0_83 = arith.constant 0 : index
    %c0_84 = arith.constant 0 : index
    %178 = vector.load %arg5[%c8, %c0_83, %c0_84] : memref<9x8x8xf32, #tpu.memory_space<vmem>>, vector<1x8x8xf32>
    %179 = vector.shape_cast %178 : vector<1x8x8xf32> to vector<8x8xf32>
    %cst_85 = arith.constant dense<0.000000e+00> : vector<8x256xf32>
    %180 = tpu.matmul %179, %177, %cst_85 {dimension_numbers = #tpu.dot_dimension_numbers<[1], [0], [0], [1], [0, 0, 1, 1], [], []>} : vector<8x8xf32>, vector<8x256xf32>, vector<8x256xf32> -> vector<8x256xf32>
    %181 = arith.addf %162, %180 : vector<8x256xf32>
    %c0_86 = arith.constant 0 : index
    %c0_87 = arith.constant 0 : index
    %182 = vector.load %arg6[%c0_86, %c0_87] : memref<8x1xf32, #tpu.memory_space<vmem>>, vector<8x1xf32>
    %183 = vector.broadcast %182 : vector<8x1xf32> to vector<8x256xf32>
    %184 = arith.addf %181, %183 : vector<8x256xf32>
    %c0_88 = arith.constant 0 : index
    %c0_89 = arith.constant 0 : index
    %185 = vector.load %arg7[%c0_88, %c0_89] : memref<8x256xf32, #tpu.memory_space<vmem>>, vector<8x256xf32>
    tpu.vector_store %arg7[%c0_88, %c0_89], %184 {strides = array<i32>} : memref<8x256xf32, #tpu.memory_space<vmem>>, vector<8x256xf32>,
    %cst_90 = arith.constant dense<0.000000e+00> : vector<8xf32>
    %186 = vector.multi_reduction <add>, %184, %cst_90 [1] : vector<8x256xf32> to vector<8xf32>
    %187 = vector.shape_cast %186 : vector<8xf32> to vector<8x1xf32>
    %cst_91 = arith.constant 2.560000e+02 : f32
    %188 = vector.broadcast %cst_91 : f32 to vector<8x1xf32>
    %189 = arith.divf %187, %188 : vector<8x1xf32>
    %190 = vector.broadcast %189 : vector<8x1xf32> to vector<8x256xf32>
    %191 = arith.subf %184, %190 : vector<8x256xf32>
    %192 = arith.mulf %191, %191 : vector<8x256xf32>
    %cst_92 = arith.constant dense<0.000000e+00> : vector<8xf32>
    %193 = vector.multi_reduction <add>, %192, %cst_92 [1] : vector<8x256xf32> to vector<8xf32>
    %194 = vector.shape_cast %193 : vector<8xf32> to vector<8x1xf32>
    %c0_i32_93 = arith.constant 0 : i32
    %195 = arith.cmpi eq, %arg0, %c0_i32_93 : i32
    %196 = arith.extui %195 : i1 to i32
    %c0_i32_94 = arith.constant 0 : i32
    %197 = arith.cmpi ne, %196, %c0_i32_94 : i32
    scf.if %197 {
      %c0_97 = arith.constant 0 : index
      %c0_98 = arith.constant 0 : index
      %201 = vector.load %arg8[%c0_97, %c0_98] : memref<8x1xf32, #tpu.memory_space<vmem>>, vector<8x1xf32>
      tpu.vector_store %arg8[%c0_97, %c0_98], %189 {strides = array<i32>} : memref<8x1xf32, #tpu.memory_space<vmem>>, vector<8x1xf32>,
      %c0_99 = arith.constant 0 : index
      %c0_100 = arith.constant 0 : index
      %202 = vector.load %arg9[%c0_99, %c0_100] : memref<8x1xf32, #tpu.memory_space<vmem>>, vector<8x1xf32>
      tpu.vector_store %arg9[%c0_99, %c0_100], %194 {strides = array<i32>} : memref<8x1xf32, #tpu.memory_space<vmem>>, vector<8x1xf32>,
    } else {
    }
    %c0_i32_95 = arith.constant 0 : i32
    %198 = arith.cmpi sgt, %arg0, %c0_i32_95 : i32
    %199 = arith.extui %198 : i1 to i32
    %c0_i32_96 = arith.constant 0 : i32
    %200 = arith.cmpi ne, %199, %c0_i32_96 : i32
    scf.if %200 {
      %c1_i32_97 = arith.constant 1 : i32
      %201 = vector.broadcast %c1_i32_97 : i32 to vector<1x1xi32>
      %202 = vector.broadcast %arg0 : i32 to vector<1x1xi32>
      %203 = arith.addi %201, %202 : vector<1x1xi32>
      %204 = arith.sitofp %203 : vector<1x1xi32> to vector<1x1xf32>
      %cst_98 = arith.constant 1.000000e+00 : f32
      %205 = vector.broadcast %cst_98 : f32 to vector<1x1xf32>
      %206 = arith.divf %205, %204 : vector<1x1xf32>
      %c0_99 = arith.constant 0 : index
      %c0_100 = arith.constant 0 : index
      %207 = vector.load %arg8[%c0_99, %c0_100] : memref<8x1xf32, #tpu.memory_space<vmem>>, vector<8x1xf32>
      %208 = arith.subf %189, %207 : vector<8x1xf32>
      %c0_101 = arith.constant 0 : index
      %c0_102 = arith.constant 0 : index
      %209 = vector.load %arg8[%c0_101, %c0_102] : memref<8x1xf32, #tpu.memory_space<vmem>>, vector<8x1xf32>
      %210 = vector.broadcast %206 : vector<1x1xf32> to vector<8x1xf32>
      %211 = arith.mulf %208, %210 : vector<8x1xf32>
      %212 = arith.addf %209, %211 : vector<8x1xf32>
      %c0_103 = arith.constant 0 : index
      %c0_104 = arith.constant 0 : index
      %213 = vector.load %arg8[%c0_103, %c0_104] : memref<8x1xf32, #tpu.memory_space<vmem>>, vector<8x1xf32>
      tpu.vector_store %arg8[%c0_103, %c0_104], %212 {strides = array<i32>} : memref<8x1xf32, #tpu.memory_space<vmem>>, vector<8x1xf32>,
      %c0_105 = arith.constant 0 : index
      %c0_106 = arith.constant 0 : index
      %214 = vector.load %arg9[%c0_105, %c0_106] : memref<8x1xf32, #tpu.memory_space<vmem>>, vector<8x1xf32>
      %215 = arith.addf %214, %194 : vector<8x1xf32>
      %216 = arith.mulf %208, %208 : vector<8x1xf32>
      %cst_107 = arith.constant 1.000000e+00 : f32
      %217 = vector.broadcast %cst_107 : f32 to vector<1x1xf32>
      %218 = arith.subf %217, %206 : vector<1x1xf32>
      %cst_108 = arith.constant 2.560000e+02 : f32
      %219 = vector.broadcast %cst_108 : f32 to vector<1x1xf32>
      %220 = arith.mulf %219, %218 : vector<1x1xf32>
      %221 = vector.broadcast %220 : vector<1x1xf32> to vector<8x1xf32>
      %222 = arith.mulf %216, %221 : vector<8x1xf32>
      %223 = arith.addf %215, %222 : vector<8x1xf32>
      %c0_109 = arith.constant 0 : index
      %c0_110 = arith.constant 0 : index
      %224 = vector.load %arg9[%c0_109, %c0_110] : memref<8x1xf32, #tpu.memory_space<vmem>>, vector<8x1xf32>
      tpu.vector_store %arg9[%c0_109, %c0_110], %223 {strides = array<i32>} : memref<8x1xf32, #tpu.memory_space<vmem>>, vector<8x1xf32>,
    } else {
    }
    return
  }
  func.func @transform_0(%arg0: i32) -> (i32, i32) {
    %c1_i32 = arith.constant 1 : i32
    %0 = arith.subi %arg0, %c1_i32 : i32
    %c0_i32 = arith.constant 0 : i32
    %1 = arith.maxsi %0, %c0_i32 : i32
    %c0_i32_0 = arith.constant 0 : i32
    %c0_i32_1 = arith.constant 0 : i32
    return %c0_i32_0, %1 : i32, i32
  }
  func.func @transform_1(%arg0: i32) -> (i32, i32) {
    %c0_i32 = arith.constant 0 : i32
    %c0_i32_0 = arith.constant 0 : i32
    return %c0_i32, %arg0 : i32, i32
  }
  func.func @transform_2(%arg0: i32) -> (i32, i32) {
    %c1_i32 = arith.constant 1 : i32
    %0 = arith.addi %arg0, %c1_i32 : i32
    %c1_i32_0 = arith.constant 1 : i32
    %1 = arith.minsi %0, %c1_i32_0 : i32
    %c0_i32 = arith.constant 0 : i32
    %c0_i32_1 = arith.constant 0 : i32
    return %c0_i32, %1 : i32, i32
  }
  func.func @transform_3(%arg0: i32) -> (i32, i32) {
    %c0_i32 = arith.constant 0 : i32
    %c0_i32_0 = arith.constant 0 : i32
    %c0_i32_1 = arith.constant 0 : i32
    return %c0_i32, %c0_i32_0 : i32, i32
  }
  func.func @transform_4(%arg0: i32) -> (i32, i32, i32) {
    %c0_i32 = arith.constant 0 : i32
    %c0_i32_0 = arith.constant 0 : i32
    %c0_i32_1 = arith.constant 0 : i32
    %c0_i32_2 = arith.constant 0 : i32
    return %c0_i32, %c0_i32_0, %c0_i32_1 : i32, i32, i32
  }
  func.func @transform_5(%arg0: i32) -> (i32, i32) {
    %c0_i32 = arith.constant 0 : i32
    %c0_i32_0 = arith.constant 0 : i32
    %c0_i32_1 = arith.constant 0 : i32
    return %c0_i32, %c0_i32_0 : i32, i32
  }
  func.func @transform_6(%arg0: i32) -> (i32, i32) {
    %c0_i32 = arith.constant 0 : i32
    %c0_i32_0 = arith.constant 0 : i32
    return %c0_i32, %arg0 : i32, i32
  }
  func.func @transform_7(%arg0: i32) -> (i32, i32) {
    %c0_i32 = arith.constant 0 : i32
    %c0_i32_0 = arith.constant 0 : i32
    %c0_i32_1 = arith.constant 0 : i32
    return %c0_i32, %c0_i32_0 : i32, i32
  }
  func.func @transform_8(%arg0: i32) -> (i32, i32) {
    %c0_i32 = arith.constant 0 : i32
    %c0_i32_0 = arith.constant 0 : i32
    %c0_i32_1 = arith.constant 0 : i32
    return %c0_i32, %c0_i32_0 : i32, i32
  }
}

</mosaic_0001>

<bundles_post_ra>
// kernel: tpu_custom_call.1
= control target key start
LH: loop header
LB: loop body
LE: loop exit
PB: predicated region body
PF: predicated region fallthrough
CT: control target
= control target key end

     0   :  { %14 = vsyncpa [#allocation3], 0  ;;  %s2101_s0 = inlined_call_operand.vmem [shape: f32[8,512], index: 0, kind: input, shape index: {}]   ;;  %s2102_s1 = inlined_call_operand.vmem [shape: f32[8,512], index: 1, kind: input, shape index: {}]   ;;  %s2103_s2 = inlined_call_operand.vmem [shape: f32[8,512], index: 2, kind: input, shape index: {}]   ;;  %s2104_s3 = inlined_call_operand.vmem [shape: s32[3,256], index: 3, kind: input, shape index: {}]   ;;  %s2105_s4 = inlined_call_operand.vmem [shape: f32[9,8,8], index: 4, kind: input, shape index: {}]   ;;  %s2106_s5 = inlined_call_operand.vmem [shape: f32[8,1], index: 5, kind: input, shape index: {}]   ;;  %s2107_s6 = inlined_call_operand.hbm [shape: f32[8,512], index: 6, kind: output, shape index: {0}]   ;;  %s2108_s7 = inlined_call_operand.vmem [shape: f32[8,1], index: 7, kind: output, shape index: {1}]   ;;  %s2109_s8 = inlined_call_operand.vmem [shape: f32[8,1], index: 8, kind: output, shape index: {2}]  }
   0x1   :  { %16 = vsyncpa [#allocation3 + $0x1], 0  ;;  %s1714_s27 = smov 0   ;;  %s1716_s28 = smov 0  }
   0x2   :  { %s1718_s29 = smov 0   ;;  %s1720_s30 = smov 0  }
   0x3 LB: > { %s1735_s9 = sadd.s32 4294967295, %s1656_s30   ;;  %s1469_s10 = sadd.s32 4294967294, %s1656_s30   ;;  %s1656_s30 = sphi %s1720_s30, %s2127_s30   ;;  %s1652_s29 = sphi %s1718_s29, %s2126_s29   ;;  %s1648_s28 = sphi %s1716_s28, %s2125_s28   ;;  %s1644_s27 = sphi %s1714_s27, %s2124_s27  }
   0x4   : > { %s1739_s11 = sadd.s32 1, %s1656_s30   ;;  %s182_s12 = sadd.s32 1, %s1652_s29 }
   0x5   : > { %s179_s13 = ssub.s32 %s1656_s30, %s1739_s11  ;;  %p192_p0 = scmp.ne.s32.totalorder %s1652_s29, %s1648_s28 }
   0x6   : > { %p180_p1 = scmp.eq.s32.totalorder %s179_s13, 0  ;;  %p193_p2 = scmp.eq.s32.totalorder %s1735_s9, 1 }
   0x7   : > { %p198_p3 = scmp.ne.s32.totalorder %s1648_s28, %s1644_s27  ;;  %p199_p4 = scmp.eq.s32.totalorder %s1469_s10, 1 }
   0x8   : > { %s1750_s14 = scalar_select %p180_p1, %s1652_s29, %s182_s12  }
   0x9   : > { %p1752_p5 = por %p193_p2, %p192_p0  ;;  %p1756_p6 = por %p199_p4, %p198_p3 }
   0xa   : > { %p1474_p7 = scmp.ge.s32.totalorder %s1656_s30, 1  ;;  %p307_p8 = scmp.lt.s32.totalorder %s1656_s30, 3 }
   0xc   : > { %p308_p9 = pnand %p1474_p7, %p307_p8 }
   0xd   : > { %s1479_s17 = sshll.u32 (!%p308_p9), %s1735_s9, 1  ;;  %v1484_v0 = vld [vmem:[%s2104_s3 + $0x2] ss:$4 sm:$0x3] (!%p308_p9)  ;;  %v399_v1 = vlaneseq (!%p308_p9)  ;;  %s1476_s20 = sadd.s32 (!%p308_p9), 4294967295, %s1735_s9  ;;  %v1658_v2 = vmov (!%p308_p9), 0  }
   0xe   : > { %311 = sbr.rel (%p308_p9) target bundleno = 738 (0x2e2), region = 44  ;;  %p370_p10 = scmp.lt.s32.totalorder (!%p308_p9), %s1479_s17, 3  ;;  %vm395_vm0 = vcmp.eq.s32.totalorder (!%p308_p9), %v1484_v0, 15  ;;  %1591 = vset.pattern.permute.xlu0 (!%p308_p9), %v1658_v2  ;;  %v1659_v4 = vmov (!%p308_p9), 0.0   ;;  %vm411_vm1 = vcmp.eq.s32.totalorder (!%p308_p9), %v1484_v0, 0  ;;  %vm481_vm2 = vcmask (!%p308_p9), 64512  }
   0xf   : > { %p358_p11 = scmp.gt.s32.totalorder (!%p308_p9), %s1476_s20, 0  ;;  %v400_v3 = vshrl.u32 (!%p308_p9), %v399_v1, 7  ;;  %900 = vmatprep.mubr.f32.mxu0 (!%p308_p9), %v1659_v4  ;;  %549 = vmatprep.mubr.f32.mxu1 (!%p308_p9), %v1659_v4  ;;  %v388_v5 = vld [vmem:[%s2104_s3] ss:$4 sm:$0x3] (!%p308_p9)  ;;  %v398_v6 = vsel (!%p308_p9), %vm395_vm0, 1, %v1658_v2 }
  0x10   : > { %v637_v9 = vadd.s32 (!%p308_p9), 1, %v388_v5  ;;  %v1500_v10 = vld [vmem:[%s2105_s4 + $0x20] sm:$0xff] (!%p308_p9)  ;;  %v414_v20 = vsel (!%p308_p9), %vm411_vm1, 1, %v1658_v2  ;;  %v440_v23 = vadd.s32 (!%p308_p9), 4294967295, %v388_v5  ;;  %s1666_s22 = smov (!%p308_p9), 1   ;;  %v1934_v61 = vand.u32 (!%p308_p9), 127, %v399_v1 }
  0x11   : > { %v1775_v7 = vsub.s32 (!%p308_p9), 0, %v400_v3  ;;  %v1777_v8 = vsub.s32 (!%p308_p9), 1, %v400_v3  ;;  %v1483_v11 = vld [vmem:[%s2104_s3 + $0x1] ss:$4 sm:$0x3] (!%p308_p9)  ;;  %v1502_v3 = vld [vmem:[%s2105_s4 + $0x28] sm:$0xff] (!%p308_p9) }
  0x12   : > { %vm638_vm3 = vcmp.ge.s32.totalorder (!%p308_p9), %v637_v9, 0  ;;  %vm639_vm4 = vcmp.lt.s32.totalorder (!%p308_p9), %v637_v9, 16  ;;  %v427_v18 = vadd.s32 (!%p308_p9), 4294967295, %v1483_v11  ;;  %v1007_v19 = vadd.s32 (!%p308_p9), 1, %v1483_v11  ;;  %v1307_v60 = vld [vmem:[%s2106_s5] sm:$0xff] (!%p308_p9)  ;;  %v1485_v11 = vld [vmem:[%s2105_s4 + $0x8] sm:$0xff] (!%p308_p9) }
  0x13   : > { %v402_v14 = vrot.slane (!%p308_p9), %v398_v6, %v1775_v7  ;;  %v406_v15 = vrot.slane (!%p308_p9), %v398_v6, %v1777_v8  ;;  %vm1797_vm5 = vmand (!%p308_p9), %vm638_vm3, %vm639_vm4  ;;  %vm441_vm11 = vcmp.ge.s32.totalorder (!%p308_p9), %v440_v23, 0  ;;  %vm442_vm12 = vcmp.lt.s32.totalorder (!%p308_p9), %v440_v23, 16  ;;  %v1510_v31 = vld [vmem:[%s2105_s4 + $0x38] sm:$0xff] (!%p308_p9)  ;;  %s350_s13 = sand.u32 (!%p308_p9), 1, %s1648_s28   ;;  %p1518_p1 = scmp.ne.s32.totalorder (!%p308_p9), %s1735_s9, 0 }
  0x14   : > { %v1805_v17 = vsel (!%p308_p9), %vm1797_vm5, 1, %v1658_v2  ;;  %vm428_vm8 = vcmp.ge.s32.totalorder (!%p308_p9), %v427_v18, 0  ;;  %vm429_vm9 = vcmp.lt.s32.totalorder (!%p308_p9), %v427_v18, 16  ;;  %vm1008_vm13 = vcmp.ge.s32.totalorder (!%p308_p9), %v1007_v19, 0  ;;  %vm1840_vm15 = vmand (!%p308_p9), %vm441_vm11, %vm442_vm12  ;;  %s1475_s18 = sshll.u32 (!%p308_p9), %s350_s13, 4 }
  0x15   : > { %s2129_s17 = smov (!%p370_p10, %s1479_s17), 3  ;;  %s2131_s20 = smov (!%p358_p11, %s1476_s20), 0  ;;  %v920_v21 = vrot.slane %v1805_v17, %v1775_v7  ;;  %v924_v22 = vrot.slane %v1805_v17, %v1777_v8  ;;  %vm1816_vm6 = vcmp.eq.s32.totalorder %v402_v14, 1  ;;  %vm1820_vm7 = vcmp.eq.s32.totalorder %v406_v15, 1  ;;  %vm1830_vm10 = vmand %vm428_vm8, %vm429_vm9 }
  0x16   : > { %s1480_s23 = sshll.u32 %s2129_s17, 3  ;;  %s1477_s10 = sshll.u32 %s2131_s20, 1  ;;  %vm1009_vm14 = vcmp.lt.s32.totalorder %v1007_v19, 16  ;;  %v422_v29 = vrot.slane %v414_v20, %v1777_v8  ;;  %v1838_v30 = vsel %vm1830_vm10, 1, %v1658_v2  ;;  %vm444_vm0 = vmand %vm1830_vm10, %vm1840_vm15  ;;  %v418_v40 = vrot.slane %v414_v20, %v1775_v7  ;;  %v458_v20 = vld [vmem:[%s2105_s4] sm:$0xff] }
  0x17   : > { %s373_s26 = scalar_lea.vmem %s2102_s1, %s1480_s23  ;;  %p361_p12 = scmp.lt.s32.totalorder %s1477_s10, 3  ;;  %v474_v33 = vrot.slane %v1838_v30, %v1777_v8  ;;  %v470_v34 = vrot.slane %v1838_v30, %v1775_v7  ;;  %v1859_v36 = vsel %vm444_vm0, 1, %v1658_v2  ;;  %vm1863_vm1 = vmand %vm1008_vm13, %vm1009_vm14  ;;  %v1910_v53 = vsel %vm1840_vm15, 1, %v1658_v2  ;;  %v1492_v30 = vld [vmem:[%s2105_s4 + $0x10] sm:$0xff] }
  0x18   : > { %v1788_v12 = vld [vmem:[%s373_s26] sm:$0xff]  ;;  %v1790_v13 = vld [vmem:[%s373_s26 + $0x8] sm:$0xff]  ;;  %s375_s17 = sadd.s32 1, %s1735_s9  ;;  %s1660_s20 = smov 127   ;;  %v449_v38 = vrot.slane %v1859_v36, %v1775_v7  ;;  %v453_v39 = vrot.slane %v1859_v36, %v1777_v8  ;;  %vm1018_vm3 = vmand %vm1863_vm1, %vm1840_vm15  ;;  %vm424_vm4 = vcmp.eq.s32.totalorder %v422_v29, 1  ;;  %v1896_v46 = vsel %vm1863_vm1, 1, %v1658_v2 }
  0x19   : > { %909 = vrot.lane.b32.xlu1 %v1788_v12, %s1660_s20  ;;  %p376_p13 = scmp.lt.s32.totalorder %s375_s17, 1  ;;  %836 = vmatprep.subr.mxu0 %v1790_v13  ;;  %s2133_s10 = smov (!%p361_p12, %s1477_s10), 3  ;;  %v1877_v41 = vsel %vm1018_vm3, 1, %v1658_v2  ;;  %v1121_v51 = vrot.slane %v1896_v46, %v1775_v7  ;;  %v1125_v52 = vrot.slane %v1896_v46, %v1777_v8  ;;  %v748_v55 = vrot.slane %v1910_v53, %v1777_v8  ;;  %vm1215_vm8 = vmand %vm1863_vm1, %vm1797_vm5 }
  0x1a   : > { %837 = vmatpush1.msra.mxu0 %v1788_v12  ;;  %s1478_s21 = sshll.u32 %s2133_s10, 3  ;;  %s1661_s26 = smov 16   ;;  %v1023_v42 = vrot.slane %v1877_v41, %v1775_v7  ;;  %v1027_v43 = vrot.slane %v1877_v41, %v1777_v8  ;;  %v744_v56 = vrot.slane %v1910_v53, %v1775_v7  ;;  %v1922_v57 = vsel %vm1215_vm8, 1, %v1658_v2 }
  0x1b   : > { %s2135_s17 = smov (!%p376_p13, %s375_s17), 1  ;;  %1501 = vmatmul.mubr.msk.f32.vlgmr.msra.gmra.mrb[0].mxu0 %vm481_vm2, %v1500_v10  ;;  %s364_s24 = scalar_lea.vmem %s2101_s0, %s1478_s21  ;;  %v1224_v58 = vrot.slane %v1922_v57, %v1777_v8  ;;  %v1220_v59 = vrot.slane %v1922_v57, %v1775_v7  ;;  %vm926_vm9 = vcmp.eq.s32.totalorder %v924_v22, 1  ;;  %vm463_vm11 = vcmp.lt.s32.totalorder %v1934_v61, 16 }
  0x1c   : > { %998 = vmatprep.mubr.f32.mxu0 %v1659_v4  ;;  %s1481_s25 = sshll.u32 %s2135_s17, 1  ;;  %v396_v27 = vld [vmem:[%s364_s24] sm:$0xff]  ;;  %v397_v28 = vld [vmem:[%s364_s24 + $0x8] sm:$0xff]  ;;  %s1662_s10 = smov 17   ;;  %vm476_vm12 = vcmp.eq.s32.totalorder %v474_v33, 1  ;;  %vm475_vm13 = vcmp.eq.s32.totalorder %v470_v34, 1 }
  0x1d   : > { %911 = vrot.lane.b32.xlu1 %v1790_v13, %s1660_s20  ;;  %p379_p0 = scmp.lt.s32.totalorder %s1481_s25, 3  ;;  %v409_v32 = vsel %vm1816_vm6, %v396_v27, %v1788_v12  ;;  %v410_v35 = vsel %vm1820_vm7, %v397_v28, %v1790_v13  ;;  %vm641_vm6 = vmand %vm1830_vm10, %vm1797_vm5  ;;  %s1663_s17 = smov 113   ;;  %vm423_vm7 = vcmp.eq.s32.totalorder %v418_v40, 1  ;;  %vm913_vm5 = vcmp.lt.s32.totalorder %v1934_v61, 127 }
  0x1e   : > { %459 = vrot.lane.b32.xlu0 %v409_v32, %s1661_s26  ;;  %v1891_v45 = vsel %vm641_vm6, 1, %v1658_v2  ;;  %s1664_s20 = smov 15   ;;  %s1665_s21 = smov 112   ;;  %vm925_vm10 = vcmp.eq.s32.totalorder %v920_v21, 1  ;;  %vm437_vm14 = vcmp.lt.s32.totalorder %v1934_v61, 17  ;;  %vm455_vm15 = vcmp.eq.s32.totalorder %v453_v39, 1 }
  0x1f   : > { %s2137_s25 = smov (!%p379_p0, %s1481_s25), 3  ;;  %v646_v49 = vrot.slane %v1891_v45, %v1775_v7  ;;  %v650_v50 = vrot.slane %v1891_v45, %v1777_v8  ;;  %s1667_s23 = smov 111   ;;  %vm454_vm0 = vcmp.eq.s32.totalorder %v449_v38, 1  ;;  %vm1015_vm1 = vcmp.lt.s32.totalorder %v1934_v61, 113  ;;  %v1506_v21 = vld [vmem:[%s2105_s4 + $0x30] sm:$0xff]  ;;  %v1514_v39 = vld [vmem:[%s2105_s4 + $0x40] sm:$0xff] }
  0x20   : > { %s1482_s12 = sshll.u32 %s2137_s25, 3  ;;  %vm1029_vm3 = vcmp.eq.s32.totalorder %v1027_v43, 1  ;;  %vm634_vm6 = vcmp.lt.s32.totalorder %v1934_v61, 15 }
  0x21   : > { %433 = vrot.lane.b32.xlu1 %v410_v35, %s1662_s10  ;;  %s382_s19 = scalar_lea.vmem %s2103_s2, %s1482_s12  ;;  %vm651_vm8 = vcmp.eq.s32.totalorder %v646_v49, 1 }
  0x22   : > { %461 = vrot.lane.b32.xlu0 %v410_v35, %s1661_s26  ;;  %v413_v44 = vld [vmem:[%s382_s19 + $0x8] sm:$0xff]  ;;  %v412_v48 = vld [vmem:[%s382_s19] sm:$0xff]  ;;  %s2033_s19 = scalar_lea.vmem [#allocation2], %s1475_s18 }
  0x23   : > { %v426_v47 = vsel %vm424_vm4, %v413_v44, %v1790_v13  ;;  %v425_v54 = vsel %vm423_vm7, %v412_v48, %v1788_v12  ;;  %vm1028_vm4 = vcmp.eq.s32.totalorder %v1023_v42, 1  ;;  %vm652_vm7 = vcmp.eq.s32.totalorder %v650_v50, 1 }
  0x25   : > { %1013 = vrot.lane.b32.xlu1 %v426_v47, %s1663_s17 }
  0x26   : > { %431 = vrot.lane.b32.xlu0 %v409_v32, %s1662_s10 }
  0x29   : > { %632 = vrot.lane.b32.xlu1 %v410_v35, %s1664_s20 }
  0x2a   : > { %1011 = vrot.lane.b32.xlu0 %v425_v54, %s1663_s17 }
  0x2d   : > { %1112 = vrot.lane.b32.xlu1 %v426_v47, %s1665_s21 }
  0x2e   : > { %630 = vrot.lane.b32.xlu0 %v409_v32, %s1664_s20 }
  0x31   : > { %735 = vrot.lane.b32.xlu1 %v1790_v13, %s1666_s22 }
  0x32   : > { %1110 = vrot.lane.b32.xlu0 %v425_v54, %s1665_s21 }
  0x35   : > { %1210 = vrot.lane.b32.xlu1 %v426_v47, %s1667_s23 }
  0x36   : > { %733 = vrot.lane.b32.xlu0 %v1788_v12, %s1666_s22 }
  0x3a   : > { %1208 = vrot.lane.b32.xlu0 %v425_v54, %s1667_s23 }
  0x3e   : > { %1310 = vperm.xlu0 %1591, %v1307_v60  }
  0x8b   : > { %v910_v62 = vpop.permute.xlu1 %909 }
  0x8f   : > { %v912_v63 = vpop.permute.xlu1 %911 }
  0x90   : > { %v914_v0 = vsel %vm913_vm5, %v910_v62, %v912_v63  ;;  %v915_v2 = vsel %vm913_vm5, %v912_v63, %v910_v62  ;;  %v460_v1 = vpop.permute.xlu0 %459  ;;  %vm1114_vm5 = vcmp.lt.s32.totalorder %v1934_v61, 112 }
  0x91   : > { %1503 = vmatprep.subr.msk.mxu0 %vm926_vm9, %v915_v2  ;;  %vm1127_vm9 = vcmp.eq.s32.totalorder %v1125_v52, 1 }
  0x92   : > { %1504 = vmatpush1.msk.msra.mxu0 %vm925_vm10, %v914_v0  ;;  %vm1126_vm10 = vcmp.eq.s32.totalorder %v1121_v51, 1 }
  0x93   : > { %1505 = vmatmul.mubr.msk.f32.vlgmr.msra.gmra.mrb[0].mxu0 %vm481_vm2, %v1502_v3  ;;  %v434_v5 = vpop.permute.xlu1 %433 }
  0x94   : > { %1101 = vmatprep.mubr.f32.mxu0 %v1659_v4  ;;  %v462_v6 = vpop.permute.xlu0 %461 }
  0x95   : > { %v464_v9 = vsel %vm463_vm11, %v460_v1, %v462_v6  ;;  %v465_v10 = vsel %vm463_vm11, %v462_v6, %v460_v1  ;;  %vm737_vm11 = vcmp.lt.s32.totalorder %v1934_v61, 1 }
  0x96   : > { %1486 = vmatprep.subr.msk.mxu1 %vm476_vm12, %v464_v9  ;;  %vm750_vm12 = vcmp.eq.s32.totalorder %v748_v55, 1 }
  0x97   : > { %v1014_v12 = vpop.permute.xlu1 %1013  ;;  %1487 = vmatpush1.msk.msra.mxu1 %vm475_vm13, %v465_v10  ;;  %vm749_vm13 = vcmp.eq.s32.totalorder %v744_v56, 1 }
  0x98   : > { %1488 = vmatmul.mubr.msk.f32.vlgmr.msra.gmra.mrb[0].mxu1 %vm481_vm2, %v1485_v11  ;;  %v432_v13 = vpop.permute.xlu0 %431 }
  0x99   : > { %v438_v14 = vsel %vm437_vm14, %v432_v13, %v434_v5  ;;  %v439_v15 = vsel %vm437_vm14, %v434_v5, %v432_v13  ;;  %623 = vmatprep.mubr.f32.mxu1 %v1659_v4  ;;  %vm1212_vm14 = vcmp.lt.s32.totalorder %v1934_v61, 111 }
  0x9a   : > { %1489 = vmatprep.subr.msk.mxu1 %vm455_vm15, %v438_v14  ;;  %vm1226_vm15 = vcmp.eq.s32.totalorder %v1224_v58, 1 }
  0x9b   : > { %v633_v16 = vpop.permute.xlu1 %632  ;;  %1490 = vmatpush1.msk.msra.mxu1 %vm454_vm0, %v439_v15  ;;  %vm1225_vm0 = vcmp.eq.s32.totalorder %v1220_v59, 1 }
  0x9c   : > { %v1012_v17 = vpop.permute.xlu0 %1011 }
  0x9d   : > { %v1016_v18 = vsel %vm1015_vm1, %v1012_v17, %v1014_v12  ;;  %v1017_v19 = vsel %vm1015_vm1, %v1014_v12, %v1012_v17 }
  0x9e   : > { %1507 = vmatprep.subr.msk.mxu0 %vm1029_vm3, %v1017_v19 }
  0x9f   : > { %v1113_v22 = vpop.permute.xlu1 %1112  ;;  %1508 = vmatpush1.msk.msra.mxu0 %vm1028_vm4, %v1016_v18 }
  0xa0   : > { %1491 = vmatmul.mubr.msk.f32.vlgmr.msra.gmra.mrb[0].mxu1 %vm481_vm2, %v458_v20  ;;  %1509 = vmatmul.mubr.msk.f32.vlgmr.msra.gmra.mrb[0].mxu0 %vm481_vm2, %v1506_v21  ;;  %v631_v23 = vpop.permute.xlu0 %630 }
  0xa1   : > { %v635_v24 = vsel %vm634_vm6, %v631_v23, %v633_v16  ;;  %v636_v25 = vsel %vm634_vm6, %v633_v16, %v631_v23  ;;  %724 = vmatprep.mubr.f32.mxu1 %v1659_v4  ;;  %1199 = vmatprep.mubr.f32.mxu0 %v1659_v4 }
  0xa2   : > { %1493 = vmatprep.subr.msk.mxu1 %vm652_vm7, %v635_v24 }
  0xa3   : > { %1494 = vmatpush1.msk.msra.mxu1 %vm651_vm8, %v636_v25  ;;  %v736_v27 = vpop.permute.xlu1 %735 }
  0xa4   : > { %v1111_v26 = vpop.permute.xlu0 %1110 }
  0xa5   : > { %v1115_v28 = vsel %vm1114_vm5, %v1111_v26, %v1113_v22  ;;  %v1116_v29 = vsel %vm1114_vm5, %v1113_v22, %v1111_v26 }
  0xa6   : > { %1511 = vmatprep.subr.msk.mxu0 %vm1127_vm9, %v1116_v29 }
  0xa7   : > { %1512 = vmatpush1.msk.msra.mxu0 %vm1126_vm10, %v1115_v28  ;;  %v1211_v35 = vpop.permute.xlu1 %1210 }
  0xa8   : > { %1495 = vmatmul.mubr.msk.f32.vlgmr.msra.gmra.mrb[0].mxu1 %vm481_vm2, %v1492_v30  ;;  %1513 = vmatmul.mubr.msk.f32.vlgmr.msra.gmra.mrb[0].mxu0 %vm481_vm2, %v1510_v31  ;;  %v734_v32 = vpop.permute.xlu0 %733 }
  0xa9   : > { %v738_v33 = vsel %vm737_vm11, %v734_v32, %v736_v27  ;;  %v739_v34 = vsel %vm737_vm11, %v736_v27, %v734_v32  ;;  %822 = vmatprep.mubr.f32.mxu1 %v1659_v4  ;;  %1298 = vmatprep.mubr.f32.mxu0 %v1659_v4  ;;  %v1496_v4 = vld [vmem:[%s2105_s4 + $0x18] sm:$0xff] }
  0xaa   : > { %1497 = vmatprep.subr.msk.mxu1 %vm750_vm12, %v738_v33 }
  0xab   : > { %1498 = vmatpush1.msk.msra.mxu1 %vm749_vm13, %v739_v34 }
  0xac   : > { %v1209_v36 = vpop.permute.xlu0 %1208 }
  0xad   : > { %v1213_v37 = vsel %vm1212_vm14, %v1209_v36, %v1211_v35  ;;  %v1214_v38 = vsel %vm1212_vm14, %v1211_v35, %v1209_v36 }
  0xae   : > { %1515 = vmatprep.subr.msk.mxu0 %vm1226_vm15, %v1214_v38 }
  0xaf   : > { %1516 = vmatpush1.msk.msra.mxu0 %vm1225_vm0, %v1213_v37 }
  0xb0   : > { %1499 = vmatmul.mubr.msk.f32.vlgmr.msra.gmra.mrb[0].mxu1 %vm481_vm2, %v1496_v4  ;;  %1517 = vmatmul.mubr.msk.f32.vlgmr.msra.gmra.mrb[0].mxu0 %vm481_vm2, %v1514_v39  ;;  %vm1333_vm2 = vcmask (!%p1518_p1), 7168  }
  0xbd   : > { %v1311_v8 = vpop.permute.xlu0 %1310 }
 0x183   : > { %v824_v7 = vpop.f32.mrb[0].mxu1  ;;  %v1300_v40 = vpop.f32.mrb[0].mxu0 }
 0x184   : > { %v1526_v41 = vadd.f32 %v1300_v40, %v824_v7  ;;  %v826_v42 = vpop.f32.mrb[1].mxu1  ;;  %v1302_v43 = vpop.f32.mrb[1].mxu0 }
 0x185   : > { %v1527_v44 = vadd.f32 %v1302_v43, %v826_v42 }
 0x186   : > { %v1313_v45 = vadd.f32 %v1526_v41, %v1311_v8 }
 0x187   : > { %v1314_v46 = vadd.f32 %v1527_v44, %v1311_v8 }
 0x188   : > { %1315 = vst [vmem:[%s2033_s19] sm:$0xff] %v1313_v45 }
 0x189   : > { %1316 = vst [vmem:[%s2033_s19 + $0x8] sm:$0xff] %v1314_v46  ;;  %v1317_v47 = vadd.f32 %v1314_v46, %v1313_v45 }
 0x18b   : > { %1318 = vadd.xlane.f32.xlu1 %v1317_v47 }
 0x218   : > { %v1319_v48 = vpop.xlane.xlu1 %1318 }
 0x219   : > { %v1321_v49 = vmul.f32 0.00390625, %v1319_v48 }
 0x21b   : > { %v1322_v50 = vsub.f32 %v1313_v45, %v1321_v49  ;;  %v1323_v51 = vsub.f32 %v1314_v46, %v1321_v49  ;;  %1334 = vst.msk [vmem:[%s2108_s7] sm:$0xff] (!%p1518_p1), %vm1333_vm2, %v1321_v49 }
 0x21d   : > { %v1324_v52 = vmul.f32 %v1322_v50, %v1322_v50  ;;  %v1325_v53 = vmul.f32 %v1323_v51, %v1323_v51 }
 0x21f   : > { %v1326_v54 = vadd.f32 %v1325_v53, %v1324_v52 }
 0x221   : > { %1327 = vadd.xlane.f32.xlu0 %v1326_v54 }
 0x2a8   : > { %1332 = sbr.rel (%p1518_p1) target bundleno = 688 (0x2b0), region = 48 }
 0x2ae   : > { %v1328_v55 = vpop.xlane.xlu0 %1327 }
 0x2af   : > { %1335 = vst.msk [vmem:[%s2109_s8] sm:$0xff] %vm1333_vm2, %v1328_v55 }
 0x2b0 PF: > { %p1519_p2 = scmp.le.s32.totalorder %s1735_s9, 0 }
 0x2b1   : > { %v1340_v56 = vstv (!%p1519_p2), %s1735_s9  ;;  %v1345_v59 = vld [vmem:[%s2108_s7] sm:$0xff] (!%p1519_p2)  ;;  %vm1349_vm1 = vcmask (!%p1519_p2), 7168  }
 0x2b2   : > { %1339 = sbr.rel (%p1519_p2) target bundleno = 714 (0x2ca), region = 52  ;;  %v1341_v57 = vadd.s32 (!%p1519_p2), 1, %v1340_v56  ;;  %v1346_v60 = vsub.f32 (!%p1519_p2), %v1321_v49, %v1345_v59 }
 0x2b4   : > { %v1342_v58 = vcvt.s32.f32 (!%p1519_p2), %v1341_v57  ;;  %v1353_v0 = vmul.f32 (!%p1519_p2), %v1346_v60, %v1346_v60 }
 0x2b6   : > { %1592 = vrcp.f32 (!%p1519_p2), %v1342_v58  ;;  %v1351_v62 = vld [vmem:[%s2109_s8] sm:$0xff] (!%p1519_p2) }
 0x2b7   : > { %v1352_v1 = vadd.f32 (!%p1519_p2), %v1351_v62, %v1328_v55 }
 0x2c0   : > { %v1593_v61 = vpop.eup %1592 }
 0x2c1   : > { %v1347_v63 = vmul.f32 %v1593_v61, %v1346_v60  ;;  %v1354_v2 = vsub.f32 1.0, %v1593_v61 }
 0x2c3   : > { %v1348_v3 = vadd.f32 %v1347_v63, %v1345_v59  ;;  %v1355_v5 = vmul.f32 256.0, %v1354_v2 }
 0x2c5   : > { %1350 = vst.msk [vmem:[%s2108_s7] sm:$0xff] %vm1349_vm1, %v1348_v3  ;;  %v1356_v6 = vmul.f32 %v1355_v5, %v1353_v0 }
 0x2c7   : > { %v1357_v9 = vadd.f32 %v1356_v6, %v1352_v1 }
 0x2c9   : > { %1358 = vst.msk [vmem:[%s2109_s8] sm:$0xff] %vm1349_vm1, %v1357_v9 }
 0x2ca PF: > { %s1525_s20 = sshll.u32 %s1735_s9, 8  ;;  %s1374_s24 = sshll.u32 %s2033_s19, 4  ;;  %s1375_s24 = int_to_ptr.vmem [resolvable:$true] %s1374_s24 }
 0x2cb   : > { %s2062_s23 = scalar_lea.hbm %s2107_s6, %s1525_s20  ;;  %s1360_s25 = scalar_lea.sflag [#allocation3], %s350_s13 }
 0x2cc   : > { %s1594_s26 = scalar_lea.vmem %s1375_s24, 256  ;;  %s1668_s10 = smov [#allocation2]  }
 0x2cd   : > { %p1595_p3 = scmp.ne.s32.totalorder %s1375_s24, %s1594_s26  ;;  %s1598_s12 = sshll.u32 %s1668_s10, 4  ;;  %s1599_s12 = int_to_ptr.vmem [resolvable:$false] %s1598_s12 }
 0x2ce   : > { %s1600_s18 = scalar_lea.vmem %s1599_s12, 512  ;;  %p1601_p8 = scmp.lt.s32.totalorder %s1375_s24, %s1599_s12 }
 0x2cf   : > { %p1596_p4 = pnand %p1595_p3, %p1752_p5  ;;  %p1602_p9 = scmp.lt.s32.totalorder %s1600_s18, %s1594_s26 }
 0x2d1   : > { %p1597_p7 = pneg %p1596_p4  ;;  %p1603_p10 = por %p1602_p9, %p1601_p8 }
 0x2d3   : > { %p1604_p11 = pnand %p1603_p10, %p1597_p7 }
 0x2d5   : > { %1607 = shalt.err (!%p1604_p11)
}
 0x2d6   : > { %s1608_s9 = scalar_lea.hbm %s2062_s23, 256  ;;  %s1612_s17 = scalar_lea.hbm %s2107_s6, 512 }
 0x2d7   : > { %p1609_p12 = scmp.ne.s32.totalorder %s2062_s23, %s1608_s9  ;;  %p1613_p1 = scmp.lt.u32.totalorder %s2062_s23, %s2107_s6 }
 0x2d8   : > { %p1614_p2 = scmp.lt.u32.totalorder %s1612_s17, %s1608_s9  ;;  %p1616_p4 = scmp.lt.u32.totalorder %s1608_s9, %s2062_s23 }
 0x2d9   : > { %p1610_p13 = pnand %p1609_p12, %p1752_p5 }
 0x2da   : > { %p1615_p3 = por %p1614_p2, %p1613_p1 }
 0x2db   : > { %p1611_p0 = pneg %p1610_p13 }
 0x2dc   : > { %p1617_p7 = por %p1616_p4, %p1615_p3 }
 0x2de   : > { %p1618_p8 = pnand %p1617_p7, %p1611_p0 }
 0x2e0   : > { %1621 = shalt.err (!%p1618_p8)
}
 0x2e1   : > { %1542 = dma.vmem_to_hbm [thread:$0]  (%p1752_p5), %s1375_s24, 256, %s2062_s23, %s1360_s25  }
 0x2e2 PF: > { %p1548_p9 = scmp.ge.s32.totalorder %s1656_s30, 2  ;;  %s1398_s22 = sand.u32 1, %s1644_s27  }
 0x2e3   : > { %s1399_s26 = scalar_lea.sflag [#allocation3], %s1398_s22 }
 0x2e4   : > { %p1545_p10 = pnand %p1548_p9, %p1756_p6 }
 0x2e6   : > { %1639 = dma.done.wait (!%p1545_p10), %s1399_s26, 256  }
 0x2e7   : > { %1641 = vsyncadd (!%p1545_p10), %s1399_s26, 4294967040  ;;  %p19_p11 = scmp.ge.s32.totalorder %s1739_s11, 4   ;;  %s2124_s27 = smov %s1648_s28 }
 0x2e8   : > { %s2125_s28 = smov %s1652_s29  ;;  %s2126_s29 = smov %s1750_s14 }
 0x2e9   : > { %s2127_s30 = smov %s1739_s11  ;;  %21 = sbr.rel (!%p19_p11) target bundleno = 3 (0x3), region = 119 }
 0x2f0   :  { %1404 = vsyncpa [#allocation3], 1 }
 0x2f1   :  { %1406 = vsyncpa [#allocation3 + $0x1], 1 }

</bundles_post_ra>
